<compile_context>
chip_gen: v7x
topology: tpu7x:2x2x1
jax: 0.10.0
libtpu: 0.0.40
codegen_flags: <defaults>
</compile_context>

<pallas_src>
import functools

import jax
import jax.numpy as jnp
from jax.experimental import pallas as pl
from jax.experimental.pallas import tpu as pltpu

STEP_TYPE_LAST = 2          # ALF StepType.LAST
_LANE = 128                 # TPU lane width
_VMEM_BUDGET = 16 * 1024 * 1024   # target double-buffered working set (fits all gens)
_VMEM_LIMIT = 32 * 1024 * 1024    # scoped VMEM limit to request


def _one_step_td_loss_kernel(reward_ref, step_type_ref, discount_ref,
                             value_ref, target_value_ref, loss_ref, *, gamma):
    """Elementwise + time-shift hot path on one [T, TILE_B] lane-dense block."""
    rewards = reward_ref[...]                                   # [T, Bt] f32
    values = value_ref[...]                                     # [T, Bt] f32
    t = rewards.shape[0]

    is_lasts = (step_type_ref[...].astype(jnp.int32)
                == STEP_TYPE_LAST).astype(jnp.float32)          # [T, Bt] f32
    discounted_values = (discount_ref[...] * gamma) * target_value_ref[...]

    # t+1 terms via XLU sublane rotation: roll by (T-1) == roll by -1, i.e.
    # next_x[j] = x[(j+1) % T].  Row T-1 wraps row 0 back in and is masked to
    # zero below (tensor_extend_zero), so the wraparound never leaks out.
    rewards_next = pltpu.roll(rewards, shift=t - 1, axis=0)
    dv_next = pltpu.roll(discounted_values, shift=t - 1, axis=0)

    # one_step_discounted_return, evaluated on all T rows at once.
    rets = (1.0 - is_lasts) * (rewards_next + dv_next) + is_lasts * discounted_values

    # element_wise_squared_loss(returns.detach(), value[:-1])
    td = rets - values
    loss = td * td

    # tensor_extend_zero: zero out the last (wrapped) time row, single store.
    row = jax.lax.broadcasted_iota(jnp.int32, loss.shape, 0)
    loss_ref[...] = jnp.where(row < t - 1, loss, 0.0)


def one_step_td_loss(reward, step_type, discount, value, target_value,
                     gamma=0.99, tile_b=None):
    """Pallas wrapper. All inputs are time-major [T, B]; returns loss [T, B].

    step_type may be any integer dtype; pass int8 to minimize HBM traffic.
    """
    T, B = value.shape
    assert T >= 2, "sequence length must be at least 2"

    # Lane-dense layout: pad B up to a multiple of 128 so loads/stores are
    # unmasked. (Production callers should batch sequences to a lane-dense B.)
    b_pad = pl.cdiv(B, _LANE) * _LANE
    if b_pad != B:
        pad = ((0, 0), (0, b_pad - B))
        reward = jnp.pad(reward, pad)
        step_type = jnp.pad(step_type, pad)
        discount = jnp.pad(discount, pad)
        value = jnp.pad(value, pad)
        target_value = jnp.pad(target_value, pad)

    # Choose TILE_B: biggest multiple of 128 keeping
    # (2 pipeline buffers) x (4 f32 in + step_type + f32 out) under budget.
    step_bytes = jnp.dtype(step_type.dtype).itemsize
    bytes_per_lane_col = 2 * T * (4 * 4 + 4 + step_bytes)
    if tile_b is None:
        tile_b = max(_LANE, (_VMEM_BUDGET // bytes_per_lane_col) // _LANE * _LANE)
    tile_b = min(int(tile_b), b_pad)
    grid = (pl.cdiv(b_pad, tile_b),)

    spec = pl.BlockSpec((T, tile_b), lambda i: (0, i))
    kernel = functools.partial(_one_step_td_loss_kernel, gamma=gamma)

    loss = pl.pallas_call(
        kernel,
        out_shape=jax.ShapeDtypeStruct((T, b_pad), jnp.float32),
        grid=grid,
        in_specs=[spec, spec, spec, spec, spec],
        out_specs=spec,
        compiler_params=pltpu.CompilerParams(
            dimension_semantics=("parallel",),       # shards across v7x's 2 TCs
            vmem_limit_bytes=_VMEM_LIMIT),
    )(reward, step_type, discount, value, target_value)

    if b_pad != B:
        loss = loss[:, :B]
    # LossInfo(loss=loss, extra=loss)
    return {"loss": loss, "extra": loss}


def _reference(reward, step_type, discount, value, target_value, gamma=0.99):
    """Pure-JAX reference for verification."""
    is_lasts = (step_type.astype(jnp.int32) == STEP_TYPE_LAST).astype(jnp.float32)
    dv = (discount * gamma) * target_value
    rets = (1.0 - is_lasts[:-1]) * (reward[1:] + dv[1:]) + is_lasts[:-1] * dv[:-1]
    loss = (rets - value[:-1]) ** 2
    return jnp.concatenate([loss, jnp.zeros((1, loss.shape[1]), loss.dtype)], 0)


def _make_inputs(key, T, B):
    k1, k2, k3, k4, k5 = jax.random.split(key, 5)
    reward = jax.random.normal(k1, (T, B), dtype=jnp.float32)
    value = jax.random.normal(k2, (T, B), dtype=jnp.float32)
    target_value = jax.random.normal(k3, (T, B), dtype=jnp.float32)
    # step_type in {FIRST=0, MID=1, LAST=2}; carried as int8 to cut HBM traffic.
    step_type = jax.random.randint(k4, (T, B), 0, 3, dtype=jnp.int32).astype(jnp.int8)
    discount = jax.random.uniform(k5, (T, B), dtype=jnp.float32)
    return reward, step_type, discount, value, target_value


if __name__ == "__main__":
    key = jax.random.PRNGKey(0)
    k_a, k_b = jax.random.split(key)

    # Case 1: small, non-lane-aligned batch (exercises the padding path).
    T, B = 8, 32
    args = _make_inputs(k_a, T, B)
    out = one_step_td_loss(*args, gamma=0.99)
    loss = jax.block_until_ready(out["loss"])
    ref = _reference(*args, gamma=0.99)
    assert loss.shape == (T, B)
    assert jnp.allclose(loss, ref, atol=1e-5, rtol=1e-5), "mismatch vs reference (B=32)"
    assert jnp.allclose(loss[-1], 0.0), "last row must be zero (tensor_extend_zero)"

    # Case 2: lane-aligned batch with a multi-step (pipelined, parallel) grid.
    T2, B2 = 8, 256
    args2 = _make_inputs(k_b, T2, B2)
    out2 = one_step_td_loss(*args2, gamma=0.99, tile_b=128)   # grid=(2,)
    loss2 = jax.block_until_ready(out2["loss"])
    ref2 = _reference(*args2, gamma=0.99)
    assert loss2.shape == (T2, B2)
    assert jnp.allclose(loss2, ref2, atol=1e-5, rtol=1e-5), "mismatch vs reference (B=256)"
    assert jnp.allclose(loss2[-1], 0.0), "last row must be zero (tensor_extend_zero)"

    print("KERNEL_OK")
</pallas_src>

<mosaic_0001>
module attributes {stable_mosaic.version = 11 : i64} {
  func.func @_one_step_td_loss_kernel(%arg0: i32, %arg1: memref<8x128xf32, #tpu.memory_space<vmem>>, %arg2: memref<8x128xi8, #tpu.memory_space<vmem>>, %arg3: memref<8x128xf32, #tpu.memory_space<vmem>>, %arg4: memref<8x128xf32, #tpu.memory_space<vmem>>, %arg5: memref<8x128xf32, #tpu.memory_space<vmem>>, %arg6: memref<8x128xf32, #tpu.memory_space<vmem>>) attributes {dimension_semantics = [#tpu.dimension_semantics<parallel>], iteration_bounds = array<i64: 1>, scalar_prefetch = 0 : i64, scratch_operands = 0 : i64, tpu.core_type = #tpu.core_type<tc>, window_params = [{transform_indices = @transform_0, window_bounds = array<i64: 8, 128>}, {transform_indices = @transform_1, window_bounds = array<i64: 8, 128>}, {transform_indices = @transform_2, window_bounds = array<i64: 8, 128>}, {transform_indices = @transform_3, window_bounds = array<i64: 8, 128>}, {transform_indices = @transform_4, window_bounds = array<i64: 8, 128>}, {transform_indices = @transform_5, window_bounds = array<i64: 8, 128>}]} {
    %c0 = arith.constant 0 : index
    %c0_0 = arith.constant 0 : index
    %0 = vector.load %arg1[%c0, %c0_0] : memref<8x128xf32, #tpu.memory_space<vmem>>, vector<8x128xf32>
    %c0_1 = arith.constant 0 : index
    %c0_2 = arith.constant 0 : index
    %1 = vector.load %arg4[%c0_1, %c0_2] : memref<8x128xf32, #tpu.memory_space<vmem>>, vector<8x128xf32>
    %c0_3 = arith.constant 0 : index
    %c0_4 = arith.constant 0 : index
    %2 = vector.load %arg2[%c0_3, %c0_4] : memref<8x128xi8, #tpu.memory_space<vmem>>, vector<8x128xi8>
    %3 = arith.extsi %2 : vector<8x128xi8> to vector<8x128xi32>
    %c2_i32 = arith.constant 2 : i32
    %4 = vector.broadcast %c2_i32 : i32 to vector<8x128xi32>
    %5 = arith.cmpi eq, %3, %4 : vector<8x128xi32>
    %6 = arith.extui %5 : vector<8x128xi1> to vector<8x128xi32>
    %7 = arith.sitofp %6 : vector<8x128xi32> to vector<8x128xf32>
    %c0_5 = arith.constant 0 : index
    %c0_6 = arith.constant 0 : index
    %8 = vector.load %arg3[%c0_5, %c0_6] : memref<8x128xf32, #tpu.memory_space<vmem>>, vector<8x128xf32>
    %cst = arith.constant 9.900000e-01 : f32
    %9 = vector.broadcast %cst : f32 to vector<8x128xf32>
    %10 = arith.mulf %8, %9 : vector<8x128xf32>
    %c0_7 = arith.constant 0 : index
    %c0_8 = arith.constant 0 : index
    %11 = vector.load %arg5[%c0_7, %c0_8] : memref<8x128xf32, #tpu.memory_space<vmem>>, vector<8x128xf32>
    %12 = arith.mulf %10, %11 : vector<8x128xf32>
    %c7_i32 = arith.constant 7 : i32
    %13 = tpu.dynamic_rotate %0 by %c7_i32 dim 0 : vector<8x128xf32>, i32 -> vector<8x128xf32>
    %c7_i32_9 = arith.constant 7 : i32
    %14 = tpu.dynamic_rotate %12 by %c7_i32_9 dim 0 : vector<8x128xf32>, i32 -> vector<8x128xf32>
    %cst_10 = arith.constant 1.000000e+00 : f32
    %15 = vector.broadcast %cst_10 : f32 to vector<8x128xf32>
    %16 = arith.subf %15, %7 : vector<8x128xf32>
    %17 = arith.addf %13, %14 : vector<8x128xf32>
    %18 = arith.mulf %16, %17 : vector<8x128xf32>
    %19 = arith.mulf %7, %12 : vector<8x128xf32>
    %20 = arith.addf %18, %19 : vector<8x128xf32>
    %21 = arith.subf %20, %1 : vector<8x128xf32>
    %22 = arith.mulf %21, %21 : vector<8x128xf32>
    %23 = tpu.iota {dimensions = array<i32: 0>} : vector<8x128xi32>
    %c7_i32_11 = arith.constant 7 : i32
    %24 = vector.broadcast %c7_i32_11 : i32 to vector<8x128xi32>
    %25 = arith.cmpi slt, %23, %24 : vector<8x128xi32>
    %cst_12 = arith.constant 0.000000e+00 : f32
    %26 = vector.broadcast %cst_12 : f32 to vector<8x128xf32>
    %27 = arith.select %25, %22, %26 : vector<8x128xi1>, vector<8x128xf32>
    %c0_13 = arith.constant 0 : index
    %c0_14 = arith.constant 0 : index
    %28 = vector.load %arg6[%c0_13, %c0_14] : memref<8x128xf32, #tpu.memory_space<vmem>>, vector<8x128xf32>
    tpu.vector_store %arg6[%c0_13, %c0_14], %27 {strides = array<i32>} : memref<8x128xf32, #tpu.memory_space<vmem>>, vector<8x128xf32>,
    return
  }
  func.func @transform_0(%arg0: i32) -> (i32, i32) {
    %c0_i32 = arith.constant 0 : i32
    %c0_i32_0 = arith.constant 0 : i32
    return %c0_i32, %arg0 : i32, i32
  }
  func.func @transform_1(%arg0: i32) -> (i32, i32) {
    %c0_i32 = arith.constant 0 : i32
    %c0_i32_0 = arith.constant 0 : i32
    return %c0_i32, %arg0 : i32, i32
  }
  func.func @transform_2(%arg0: i32) -> (i32, i32) {
    %c0_i32 = arith.constant 0 : i32
    %c0_i32_0 = arith.constant 0 : i32
    return %c0_i32, %arg0 : i32, i32
  }
  func.func @transform_3(%arg0: i32) -> (i32, i32) {
    %c0_i32 = arith.constant 0 : i32
    %c0_i32_0 = arith.constant 0 : i32
    return %c0_i32, %arg0 : i32, i32
  }
  func.func @transform_4(%arg0: i32) -> (i32, i32) {
    %c0_i32 = arith.constant 0 : i32
    %c0_i32_0 = arith.constant 0 : i32
    return %c0_i32, %arg0 : i32, i32
  }
  func.func @transform_5(%arg0: i32) -> (i32, i32) {
    %c0_i32 = arith.constant 0 : i32
    %c0_i32_0 = arith.constant 0 : i32
    return %c0_i32, %arg0 : i32, i32
  }
}

</mosaic_0001>

<bundles_post_ra>
// kernel: tpu_custom_call.1
= control target key start
LH: loop header
LB: loop body
LE: loop exit
PB: predicated region body
PF: predicated region fallthrough
CT: control target
= control target key end

     0   :  { %10 = vsyncpa [#allocation3], 0  ;;  %s286_s0 = inlined_call_operand.hbm [shape: f32[8,128], index: 0, kind: input, shape index: {}]   ;;  %s287_s1 = inlined_call_operand.vmem [shape: s8[8,128], index: 1, kind: input, shape index: {}]   ;;  %s288_s2 = inlined_call_operand.hbm [shape: f32[8,128], index: 2, kind: input, shape index: {}]   ;;  %s289_s3 = inlined_call_operand.vmem [shape: f32[8,128], index: 3, kind: input, shape index: {}]   ;;  %s290_s4 = inlined_call_operand.hbm [shape: f32[8,128], index: 4, kind: input, shape index: {}]   ;;  %s291_s5 = inlined_call_operand.hbm [shape: f32[8,128], index: 5, kind: output, shape index: {}]  }
   0x1   :  { %11 = vsyncpa [#allocation6], 0 }
   0x2   :  { %12 = vsyncpa [#allocation4], 0  ;;  %s197_s18 = smov [#allocation5]   ;;  %s198_s20 = smov [#allocation2]  }
   0x3   :  { %s31_s19 = sshll.u32 %s197_s18, 4  ;;  %s19_s21 = sshll.u32 %s198_s20, 4  ;;  %s32_s19 = int_to_ptr.vmem [resolvable:$true] %s31_s19  ;;  %s20_s21 = int_to_ptr.vmem [resolvable:$true] %s19_s21 }
   0x4   :  { %s103_s24 = scalar_lea.hbm %s288_s2, 128 }
   0x5   :  { %p104_p0 = scmp.ne.s32.totalorder %s288_s2, %s103_s24  ;;  %p107_p1 = scmp.lt.u32.totalorder %s103_s24, %s288_s2 }
   0x7   :  { %p109_p2 = pnand %p107_p1, %p104_p0 }
   0x9   :  { %112 = shalt.err (!%p109_p2)
}
   0xa   :  { %s113_s29 = scalar_lea.vmem %s32_s19, 128  ;;  %p118_p4 = scmp.lt.s32.totalorder %s32_s19, %s32_s19 }
   0xb   :  { %p114_p3 = scmp.ne.s32.totalorder %s32_s19, %s113_s29  ;;  %p119_p5 = scmp.lt.s32.totalorder %s113_s29, %s113_s29 }
   0xd   :  { %p120_p6 = por %p119_p5, %p118_p4 }
   0xf   :  { %p121_p7 = pnand %p120_p6, %p114_p3 }
  0x11   :  { %124 = shalt.err (!%p121_p7)
}
  0x12   :  { %34 = dma.hbm_to_vmem [thread:$0]  %s288_s2, 128, %s32_s19, [#allocation6]  }
  0x13   :  { %s125_s9 = scalar_lea.hbm %s286_s0, 128 }
  0x14   :  { %p126_p8 = scmp.ne.s32.totalorder %s286_s0, %s125_s9  ;;  %p129_p9 = scmp.lt.u32.totalorder %s125_s9, %s286_s0 }
  0x16   :  { %p131_p10 = pnand %p129_p9, %p126_p8 }
  0x18   :  { %134 = shalt.err (!%p131_p10)
}
  0x19   :  { %s135_s14 = scalar_lea.vmem %s20_s21, 128  ;;  %p140_p12 = scmp.lt.s32.totalorder %s20_s21, %s20_s21 }
  0x1a   :  { %p136_p11 = scmp.ne.s32.totalorder %s20_s21, %s135_s14  ;;  %p141_p13 = scmp.lt.s32.totalorder %s135_s14, %s135_s14 }
  0x1c   :  { %p142_p0 = por %p141_p13, %p140_p12 }
  0x1e   :  { %p143_p1 = pnand %p142_p0, %p136_p11 }
  0x20   :  { %146 = shalt.err (!%p143_p1)
}
  0x21   :  { %22 = dma.hbm_to_vmem [thread:$0]  %s286_s0, 128, %s20_s21, [#allocation3]  }
  0x22   :  { %s199_s16 = smov [#allocation7]   ;;  %s147_s20 = scalar_lea.hbm %s290_s4, 128 }
  0x23   :  { %s43_s17 = sshll.u32 %s199_s16, 4  ;;  %p148_p2 = scmp.ne.s32.totalorder %s290_s4, %s147_s20  ;;  %s44_s17 = int_to_ptr.vmem [resolvable:$true] %s43_s17 }
  0x24   :  { %p151_p3 = scmp.lt.u32.totalorder %s147_s20, %s290_s4 }
  0x26   :  { %p153_p4 = pnand %p151_p3, %p148_p2 }
  0x28   :  { %156 = shalt.err (!%p153_p4)
}
  0x29   :  { %s157_s26 = scalar_lea.vmem %s44_s17, 128  ;;  %p162_p6 = scmp.lt.s32.totalorder %s44_s17, %s44_s17 }
  0x2a   :  { %p158_p5 = scmp.ne.s32.totalorder %s44_s17, %s157_s26  ;;  %p163_p7 = scmp.lt.s32.totalorder %s157_s26, %s157_s26 }
  0x2c   :  { %p164_p8 = por %p163_p7, %p162_p6 }
  0x2e   :  { %p165_p9 = pnand %p164_p8, %p158_p5 }
  0x30   :  { %168 = shalt.err (!%p165_p9)
}
  0x31   :  { %46 = dma.hbm_to_vmem [thread:$0]  %s290_s4, 128, %s44_s17, [#allocation6]  }
  0x32   :  { %191 = dma.done.wait [#allocation3], 128  }
  0x33   :  { %192 = vsyncadd [#allocation3], 4294967168 }
  0x34   :  { %193 = dma.done.wait [#allocation6], 256  }
  0x35   :  { %194 = vsyncadd [#allocation6], 4294967040  ;;  %v58_v0 = vld [vmem:[%s287_s1] sm:$0x3]  ;;  %v63_v3 = vld [vmem:[#allocation5] sm:$0xff]  ;;  %v200_v6 = vmov 0.0   ;;  %v76_v12 = vlaneseq }
  0x36   :  { %v56_v1 = vld [vmem:[#allocation2] sm:$0xff]  ;;  %v59_v2 = vunpack.c.0.s8 %v58_v0  ;;  %v65_v4 = vld [vmem:[#allocation7] sm:$0xff]  ;;  %v64_v5 = vmul.f32 0.99, %v63_v3  ;;  %s201_s1 = smov [#allocation8]  }
  0x37   :  { %v67_v9 = vrot.slane %v56_v1, 1  ;;  %v57_v16 = vld [vmem:[%s289_s3] sm:$0xff]  ;;  %v77_v17 = vshrl.u32 %v76_v12, 7  ;;  %s87_s30 = sshll.u32 %s201_s1, 4  ;;  %s88_s30 = int_to_ptr.vmem [resolvable:$true] %s87_s30 }
  0x38   :  { %vm60_vm0 = vcmp.eq.s32.totalorder %v59_v2, 2  ;;  %v66_v8 = vmul.f32 %v65_v4, %v64_v5  ;;  %s169_s6 = scalar_lea.vmem %s88_s30, 128  ;;  %p174_p11 = scmp.lt.s32.totalorder %s88_s30, %s88_s30 }
  0x39   :  { %v97_v7 = vsel %vm60_vm0, 1.0, %v200_v6  ;;  %vm78_vm1 = vcmp.lt.s32.totalorder %v77_v17, 7  ;;  %p170_p10 = scmp.ne.s32.totalorder %s88_s30, %s169_s6  ;;  %p175_p12 = scmp.lt.s32.totalorder %s169_s6, %s169_s6 }
  0x3a   :  { %v68_v10 = vrot.slane %v66_v8, 1  ;;  %v69_v11 = vsub.f32 1.0, %v97_v7  ;;  %v72_v14 = vmul.f32 %v97_v7, %v66_v8 }
  0x3b   :  { %p176_p13 = por %p175_p12, %p174_p11 }
  0x3c   :  { %v70_v13 = vadd.f32 %v68_v10, %v67_v9 }
  0x3d   :  { %p177_p0 = pnand %p176_p13, %p170_p10 }
  0x3e   :  { %v71_v15 = vmul.f32 %v70_v13, %v69_v11 }
  0x40   :  { %v73_v18 = vadd.f32 %v72_v14, %v71_v15 }
  0x42   :  { %v74_v19 = vsub.f32 %v73_v18, %v57_v16 }
  0x44   :  { %v75_v20 = vmul.f32 %v74_v19, %v74_v19 }
  0x46   :  { %v79_v21 = vsel %vm78_vm1, %v75_v20, 0.0 }
  0x47   :  { %80 = vst [vmem:[#allocation8] sm:$0xff] %v79_v21 }
  0x48   :  { %180 = shalt.err (!%p177_p0)
}
  0x49   :  { %s181_s3 = scalar_lea.hbm %s291_s5, 128 }
  0x4a   :  { %p182_p1 = scmp.ne.s32.totalorder %s291_s5, %s181_s3  ;;  %p185_p2 = scmp.lt.u32.totalorder %s181_s3, %s291_s5 }
  0x4c   :  { %p187_p3 = pnand %p185_p2, %p182_p1 }
  0x4e   :  { %190 = shalt.err (!%p187_p3)
}
  0x4f   :  { %90 = dma.vmem_to_hbm [thread:$0]  %s88_s30, 128, %s291_s5, [#allocation4]  }
  0x50   :  { %195 = dma.done.wait [#allocation4], 128  }
  0x51   :  { %196 = vsyncadd [#allocation4], 4294967168 }
  0x52   :  { %94 = vsyncpa [#allocation3], 1 }
  0x53   :  { %95 = vsyncpa [#allocation6], 1 }
  0x54   :  { %96 = vsyncpa [#allocation4], 1 }

</bundles_post_ra>
